<compile_context>
chip_gen: v7x
topology: tpu7x:2x2x1
jax: 0.10.0
libtpu: 0.0.40
codegen_flags: <defaults>
</compile_context>

<pallas_src>
import functools
import math

import numpy as np
import jax
import jax.numpy as jnp
from jax import lax
from jax.experimental import pallas as pl
from jax.experimental.pallas import tpu as pltpu

LANE = 128
# (8192, 128) f32 block = 4 MiB per input per pipeline buffer.
MAX_BLOCK_ROWS = 8192
VMEM_LIMIT_BYTES = 32 * 1024 * 1024  # fits v5e/v6e/v7x; well under physical.


def _mixed_loss_stats_kernel(pred_ref, true_ref, out_ref,
                             acc_cnt, acc_sqm, acc_sqt, acc_max,
                             *, tm, sub, tail_rows):
    """Grid = (num_blocks,) over the row axis ("arbitrary": reduction axis).

    Accumulates per-lane partials into small (sub, 128) VMEM accumulators and
    performs the final sublane reduce only on the last step:
      out[0, :] per-lane masked count, out[1, :] masked sum-sq,
      out[2, :] total sum-sq,          out[3, :] max |diff|.
    """
    j = pl.program_id(0)
    nj = pl.num_programs(0)

    @pl.when(j == 0)
    def _init():
        acc_cnt[...] = jnp.zeros_like(acc_cnt)
        acc_sqm[...] = jnp.zeros_like(acc_sqm)
        acc_sqt[...] = jnp.zeros_like(acc_sqt)
        acc_max[...] = jnp.zeros_like(acc_max)

    p = pred_ref[...].astype(jnp.float32)
    t = true_ref[...].astype(jnp.float32)
    d = p - t
    sq = d * d
    absd = jnp.abs(d)
    m = jnp.abs(t) > 1.0

    def block_sum(x):
        # (tm, LANE) -> (sub, LANE); pure VALU vreg adds when tm % 8 == 0.
        if sub == 8:
            return jnp.sum(x.reshape(tm // 8, 8, LANE), axis=0)
        return jnp.sum(x, axis=0, keepdims=True)

    def block_max(x):
        if sub == 8:
            return jnp.max(x.reshape(tm // 8, 8, LANE), axis=0)
        return jnp.max(x, axis=0, keepdims=True)

    def accumulate(sq_v, absd_v, m_v):
        acc_cnt[...] += block_sum(jnp.where(m_v, 1.0, 0.0))
        acc_sqm[...] += block_sum(jnp.where(m_v, sq_v, 0.0))
        acc_sqt[...] += block_sum(sq_v)
        acc_max[...] = jnp.maximum(acc_max[...], block_max(absd_v))

    if tail_rows == 0:
        # All blocks are full: single unmasked fast path.
        accumulate(sq, absd, m)
    else:
        @pl.when(j != nj - 1)
        def _fast():
            accumulate(sq, absd, m)

        @pl.when(j == nj - 1)
        def _tail():
            # Only the final partial block pays the row mask; rows beyond the
            # real array are garbage in VMEM -> select them away.
            row_ids = lax.broadcasted_iota(jnp.int32, (tm, LANE), 0)
            valid = row_ids < tail_rows
            accumulate(jnp.where(valid, sq, 0.0),
                       jnp.where(valid, absd, 0.0),
                       jnp.logical_and(m, valid))

    @pl.when(j == nj - 1)
    def _finalize():
        out_ref[0:1, :] = jnp.sum(acc_cnt[...], axis=0, keepdims=True)
        out_ref[1:2, :] = jnp.sum(acc_sqm[...], axis=0, keepdims=True)
        out_ref[2:3, :] = jnp.sum(acc_sqt[...], axis=0, keepdims=True)
        out_ref[3:4, :] = jnp.max(acc_max[...], axis=0, keepdims=True)


def mixed_loss(pred, true, *, max_block_rows=MAX_BLOCK_ROWS):
    assert pred.shape == true.shape
    assert max_block_rows % 8 == 0
    n = int(math.prod(pred.shape))

    pred_f = jnp.ravel(pred)   # free reshape of contiguous input, native dtype
    true_f = jnp.ravel(true)

    rem = n % LANE             # <=127 leftover elements handled in glue
    n_main = n - rem
    rows = n_main // LANE

    cnt = jnp.float32(0.0)
    s_mask = jnp.float32(0.0)
    s_total = jnp.float32(0.0)
    max_abs = jnp.float32(0.0)

    if rows > 0:
        if rem:
            pred2 = lax.slice(pred_f, (0,), (n_main,)).reshape(rows, LANE)
            true2 = lax.slice(true_f, (0,), (n_main,)).reshape(rows, LANE)
        else:
            pred2 = pred_f.reshape(rows, LANE)
            true2 = true_f.reshape(rows, LANE)

        if rows <= max_block_rows:
            tm = rows           # block == full array -> no (8,128) constraint
            num_blocks = 1
        else:
            tm = max_block_rows  # multiple of 8 (and 16, for bf16 packing)
            num_blocks = -(-rows // tm)

        sub = 8 if tm % 8 == 0 else 1
        tail_rows = rows % tm   # 0 -> every block is full

        kernel = functools.partial(_mixed_loss_stats_kernel,
                                   tm=tm, sub=sub, tail_rows=tail_rows)

        bytes_accessed = int(pred2.size * pred2.dtype.itemsize
                             + true2.size * true2.dtype.itemsize
                             + 4 * LANE * 4)

        stats = pl.pallas_call(
            kernel,
            out_shape=jax.ShapeDtypeStruct((4, LANE), jnp.float32),
            grid_spec=pltpu.PrefetchScalarGridSpec(
                num_scalar_prefetch=0,
                grid=(num_blocks,),
                in_specs=[
                    pl.BlockSpec((tm, LANE), lambda j: (j, 0)),
                    pl.BlockSpec((tm, LANE), lambda j: (j, 0)),
                ],
                out_specs=pl.BlockSpec((4, LANE), lambda j: (0, 0)),
                scratch_shapes=[pltpu.VMEM((sub, LANE), jnp.float32)] * 4,
            ),
            compiler_params=pltpu.CompilerParams(
                dimension_semantics=("arbitrary",),
                vmem_limit_bytes=VMEM_LIMIT_BYTES),
            cost_estimate=pl.CostEstimate(flops=10 * n_main,
                                          transcendentals=0,
                                          bytes_accessed=bytes_accessed),
        )(pred2, true2)

        cnt = jnp.sum(stats[0])
        s_mask = jnp.sum(stats[1])
        s_total = jnp.sum(stats[2])
        max_abs = jnp.max(stats[3])

    if rem:
        # Fold the <=127 leftover elements in with plain jnp (tiny).
        p_t = lax.slice(pred_f, (n_main,), (n,)).astype(jnp.float32)
        t_t = lax.slice(true_f, (n_main,), (n,)).astype(jnp.float32)
        d_t = p_t - t_t
        sq_t = d_t * d_t
        m_t = jnp.abs(t_t) > 1.0
        cnt = cnt + jnp.sum(m_t.astype(jnp.float32))
        s_mask = s_mask + jnp.sum(jnp.where(m_t, sq_t, 0.0))
        s_total = s_total + jnp.sum(sq_t)
        max_abs = jnp.maximum(max_abs, jnp.max(jnp.abs(d_t)))

    s_unmask = s_total - s_mask
    n_f = jnp.float32(n)

    # branch A: more than 200 masked elements -> split RMSE
    # (NaN when cnt == n matches the torch reference; jnp.where is a select
    #  so it cannot leak into branch B.)
    loss1_a = jnp.sqrt(s_mask / cnt)
    loss2_a = jnp.sqrt(s_unmask / (n_f - cnt))
    branch_a = 0.7 * loss1_a + 0.3 * loss2_a

    # branch B: overall RMSE + max abs error
    loss1_b = jnp.sqrt(s_total / n_f)
    branch_b = 0.7 * loss1_b + 0.3 * max_abs

    return jnp.where(cnt > 200.0, branch_a, branch_b)


def _ref_mixed_loss_np(pred, true):
    pred = np.asarray(pred, dtype=np.float64)
    true = np.asarray(true, dtype=np.float64)
    mask = np.abs(true) > 1
    if mask.sum() > 200:
        loss1 = np.sqrt(np.mean(np.square(pred[mask] - true[mask])))
        loss2 = np.sqrt(np.mean(np.square(pred[~mask] - true[~mask])))
        return 0.7 * loss1 + 0.3 * loss2
    else:
        loss1 = np.sqrt(np.mean(np.square(pred - true)))
        loss2 = np.max(np.abs(pred - true))
        return 0.7 * loss1 + 0.3 * loss2


if __name__ == "__main__":
    key = jax.random.PRNGKey(0)
    k1, k2 = jax.random.split(key)
    # Shapes consistent with the error-estimation network's dense outputs.
    pred = jax.random.normal(k1, (2, 4, 16, 16), dtype=jnp.float32)
    true = jax.random.normal(k2, (2, 4, 16, 16), dtype=jnp.float32) * 1.5

    out = jax.block_until_ready(mixed_loss(pred, true))
    ref = _ref_mixed_loss_np(np.asarray(pred), np.asarray(true))
    assert np.allclose(float(out), ref, rtol=1e-5, atol=1e-5), (float(out), ref)

    # Branch B (few masked elements).
    true_small = true * 0.1
    out2 = jax.block_until_ready(mixed_loss(pred, true_small))
    ref2 = _ref_mixed_loss_np(np.asarray(pred), np.asarray(true_small))
    assert np.allclose(float(out2), ref2, rtol=1e-5, atol=1e-5), (float(out2), ref2)

    # Odd total size (n % 128 = 20): exercises the remainder glue, and with a
    # tiny block, the multi-block grid + masked tail-block path.
    k3, k4 = jax.random.split(k2)
    pred_odd = jax.random.normal(k3, (3, 5, 300), dtype=jnp.float32)
    true_odd = jax.random.normal(k4, (3, 5, 300), dtype=jnp.float32) * 1.5
    ref3 = _ref_mixed_loss_np(np.asarray(pred_odd), np.asarray(true_odd))
    out3 = jax.block_until_ready(mixed_loss(pred_odd, true_odd))
    out3b = jax.block_until_ready(mixed_loss(pred_odd, true_odd, max_block_rows=8))
    assert np.allclose(float(out3), ref3, rtol=1e-4, atol=1e-5), (float(out3), ref3)
    assert np.allclose(float(out3b), ref3, rtol=1e-4, atol=1e-5), (float(out3b), ref3)

    print("KERNEL_OK")
</pallas_src>

<mosaic_0001>
module attributes {stable_mosaic.version = 11 : i64} {
  func.func @_mixed_loss_stats_kernel(%arg0: i32, %arg1: memref<16x128xf32, #tpu.memory_space<vmem>>, %arg2: memref<16x128xf32, #tpu.memory_space<vmem>>, %arg3: memref<4x128xf32, #tpu.memory_space<vmem>>, %arg4: memref<8x128xf32, #tpu.memory_space<vmem>>, %arg5: memref<8x128xf32, #tpu.memory_space<vmem>>, %arg6: memref<8x128xf32, #tpu.memory_space<vmem>>, %arg7: memref<8x128xf32, #tpu.memory_space<vmem>>) attributes {dimension_semantics = [#tpu.dimension_semantics<arbitrary>], iteration_bounds = array<i64: 1>, scalar_prefetch = 0 : i64, scratch_operands = 4 : i64, tpu.core_type = #tpu.core_type<tc>, window_params = [{transform_indices = @transform_0, window_bounds = array<i64: 16, 128>}, {transform_indices = @transform_1, window_bounds = array<i64: 16, 128>}, {pipeline_mode = #tpu.pipeline_mode<synchronous>, transform_indices = @transform_2, window_bounds = array<i64: 4, 128>}]} {
    %c0_i32 = arith.constant 0 : i32
    %0 = arith.cmpi eq, %arg0, %c0_i32 : i32
    %1 = arith.extui %0 : i1 to i32
    %c0_i32_0 = arith.constant 0 : i32
    %2 = arith.cmpi ne, %1, %c0_i32_0 : i32
    scf.if %2 {
      %cst_29 = arith.constant 0.000000e+00 : f32
      %39 = vector.broadcast %cst_29 : f32 to vector<8x128xf32>
      %c0_30 = arith.constant 0 : index
      %c0_31 = arith.constant 0 : index
      %40 = vector.load %arg4[%c0_30, %c0_31] : memref<8x128xf32, #tpu.memory_space<vmem>>, vector<8x128xf32>
      tpu.vector_store %arg4[%c0_30, %c0_31], %39 {strides = array<i32>} : memref<8x128xf32, #tpu.memory_space<vmem>>, vector<8x128xf32>,
      %cst_32 = arith.constant 0.000000e+00 : f32
      %41 = vector.broadcast %cst_32 : f32 to vector<8x128xf32>
      %c0_33 = arith.constant 0 : index
      %c0_34 = arith.constant 0 : index
      %42 = vector.load %arg5[%c0_33, %c0_34] : memref<8x128xf32, #tpu.memory_space<vmem>>, vector<8x128xf32>
      tpu.vector_store %arg5[%c0_33, %c0_34], %41 {strides = array<i32>} : memref<8x128xf32, #tpu.memory_space<vmem>>, vector<8x128xf32>,
      %cst_35 = arith.constant 0.000000e+00 : f32
      %43 = vector.broadcast %cst_35 : f32 to vector<8x128xf32>
      %c0_36 = arith.constant 0 : index
      %c0_37 = arith.constant 0 : index
      %44 = vector.load %arg6[%c0_36, %c0_37] : memref<8x128xf32, #tpu.memory_space<vmem>>, vector<8x128xf32>
      tpu.vector_store %arg6[%c0_36, %c0_37], %43 {strides = array<i32>} : memref<8x128xf32, #tpu.memory_space<vmem>>, vector<8x128xf32>,
      %cst_38 = arith.constant 0.000000e+00 : f32
      %45 = vector.broadcast %cst_38 : f32 to vector<8x128xf32>
      %c0_39 = arith.constant 0 : index
      %c0_40 = arith.constant 0 : index
      %46 = vector.load %arg7[%c0_39, %c0_40] : memref<8x128xf32, #tpu.memory_space<vmem>>, vector<8x128xf32>
      tpu.vector_store %arg7[%c0_39, %c0_40], %45 {strides = array<i32>} : memref<8x128xf32, #tpu.memory_space<vmem>>, vector<8x128xf32>,
    } else {
    }
    %c0 = arith.constant 0 : index
    %c0_1 = arith.constant 0 : index
    %3 = vector.load %arg1[%c0, %c0_1] : memref<16x128xf32, #tpu.memory_space<vmem>>, vector<16x128xf32>
    %c0_2 = arith.constant 0 : index
    %c0_3 = arith.constant 0 : index
    %4 = vector.load %arg2[%c0_2, %c0_3] : memref<16x128xf32, #tpu.memory_space<vmem>>, vector<16x128xf32>
    %5 = arith.subf %3, %4 : vector<16x128xf32>
    %6 = arith.mulf %5, %5 : vector<16x128xf32>
    %7 = math.absf %5 : vector<16x128xf32>
    %8 = math.absf %4 : vector<16x128xf32>
    %cst = arith.constant 1.000000e+00 : f32
    %9 = vector.broadcast %cst : f32 to vector<16x128xf32>
    %10 = arith.cmpf ogt, %8, %9 : vector<16x128xf32>
    %c0_4 = arith.constant 0 : index
    %c0_5 = arith.constant 0 : index
    %11 = vector.load %arg4[%c0_4, %c0_5] : memref<8x128xf32, #tpu.memory_space<vmem>>, vector<8x128xf32>
    %cst_6 = arith.constant 1.000000e+00 : f32
    %cst_7 = arith.constant 0.000000e+00 : f32
    %12 = vector.broadcast %cst_6 : f32 to vector<16x128xf32>
    %13 = vector.broadcast %cst_7 : f32 to vector<16x128xf32>
    %14 = arith.select %10, %12, %13 : vector<16x128xi1>, vector<16x128xf32>
    %15 = vector.shape_cast %14 : vector<16x128xf32> to vector<2x8x128xf32>
    %cst_8 = arith.constant dense<0.000000e+00> : vector<8x128xf32>
    %16 = vector.multi_reduction <add>, %15, %cst_8 [0] : vector<2x8x128xf32> to vector<8x128xf32>
    %17 = arith.addf %11, %16 : vector<8x128xf32>
    %c0_9 = arith.constant 0 : index
    %c0_10 = arith.constant 0 : index
    %18 = vector.load %arg4[%c0_9, %c0_10] : memref<8x128xf32, #tpu.memory_space<vmem>>, vector<8x128xf32>
    tpu.vector_store %arg4[%c0_9, %c0_10], %17 {strides = array<i32>} : memref<8x128xf32, #tpu.memory_space<vmem>>, vector<8x128xf32>,
    %c0_11 = arith.constant 0 : index
    %c0_12 = arith.constant 0 : index
    %19 = vector.load %arg5[%c0_11, %c0_12] : memref<8x128xf32, #tpu.memory_space<vmem>>, vector<8x128xf32>
    %cst_13 = arith.constant 0.000000e+00 : f32
    %20 = vector.broadcast %cst_13 : f32 to vector<16x128xf32>
    %21 = arith.select %10, %6, %20 : vector<16x128xi1>, vector<16x128xf32>
    %22 = vector.shape_cast %21 : vector<16x128xf32> to vector<2x8x128xf32>
    %cst_14 = arith.constant dense<0.000000e+00> : vector<8x128xf32>
    %23 = vector.multi_reduction <add>, %22, %cst_14 [0] : vector<2x8x128xf32> to vector<8x128xf32>
    %24 = arith.addf %19, %23 : vector<8x128xf32>
    %c0_15 = arith.constant 0 : index
    %c0_16 = arith.constant 0 : index
    %25 = vector.load %arg5[%c0_15, %c0_16] : memref<8x128xf32, #tpu.memory_space<vmem>>, vector<8x128xf32>
    tpu.vector_store %arg5[%c0_15, %c0_16], %24 {strides = array<i32>} : memref<8x128xf32, #tpu.memory_space<vmem>>, vector<8x128xf32>,
    %c0_17 = arith.constant 0 : index
    %c0_18 = arith.constant 0 : index
    %26 = vector.load %arg6[%c0_17, %c0_18] : memref<8x128xf32, #tpu.memory_space<vmem>>, vector<8x128xf32>
    %27 = vector.shape_cast %6 : vector<16x128xf32> to vector<2x8x128xf32>
    %cst_19 = arith.constant dense<0.000000e+00> : vector<8x128xf32>
    %28 = vector.multi_reduction <add>, %27, %cst_19 [0] : vector<2x8x128xf32> to vector<8x128xf32>
    %29 = arith.addf %26, %28 : vector<8x128xf32>
    %c0_20 = arith.constant 0 : index
    %c0_21 = arith.constant 0 : index
    %30 = vector.load %arg6[%c0_20, %c0_21] : memref<8x128xf32, #tpu.memory_space<vmem>>, vector<8x128xf32>
    tpu.vector_store %arg6[%c0_20, %c0_21], %29 {strides = array<i32>} : memref<8x128xf32, #tpu.memory_space<vmem>>, vector<8x128xf32>,
    %c0_22 = arith.constant 0 : index
    %c0_23 = arith.constant 0 : index
    %31 = vector.load %arg7[%c0_22, %c0_23] : memref<8x128xf32, #tpu.memory_space<vmem>>, vector<8x128xf32>
    %32 = vector.shape_cast %7 : vector<16x128xf32> to vector<2x8x128xf32>
    %cst_24 = arith.constant dense<0xFF800000> : vector<8x128xf32>
    %33 = vector.multi_reduction <maximumf>, %32, %cst_24 [0] : vector<2x8x128xf32> to vector<8x128xf32>
    %34 = arith.maximumf %31, %33 : vector<8x128xf32>
    %c0_25 = arith.constant 0 : index
    %c0_26 = arith.constant 0 : index
    %35 = vector.load %arg7[%c0_25, %c0_26] : memref<8x128xf32, #tpu.memory_space<vmem>>, vector<8x128xf32>
    tpu.vector_store %arg7[%c0_25, %c0_26], %34 {strides = array<i32>} : memref<8x128xf32, #tpu.memory_space<vmem>>, vector<8x128xf32>,
    %c0_i32_27 = arith.constant 0 : i32
    %36 = arith.cmpi eq, %arg0, %c0_i32_27 : i32
    %37 = arith.extui %36 : i1 to i32
    %c0_i32_28 = arith.constant 0 : i32
    %38 = arith.cmpi ne, %37, %c0_i32_28 : i32
    scf.if %38 {
      %c0_29 = arith.constant 0 : index
      %c0_30 = arith.constant 0 : index
      %39 = vector.load %arg4[%c0_29, %c0_30] : memref<8x128xf32, #tpu.memory_space<vmem>>, vector<8x128xf32>
      %cst_31 = arith.constant dense<0.000000e+00> : vector<128xf32>
      %40 = vector.multi_reduction <add>, %39, %cst_31 [0] : vector<8x128xf32> to vector<128xf32>
      %41 = vector.shape_cast %40 : vector<128xf32> to vector<1x128xf32>
      %c0_32 = arith.constant 0 : index
      %c0_33 = arith.constant 0 : index
      %42 = vector.load %arg3[%c0_32, %c0_33] : memref<4x128xf32, #tpu.memory_space<vmem>>, vector<1x128xf32>
      tpu.vector_store %arg3[%c0_32, %c0_33], %41 {strides = array<i32>} : memref<4x128xf32, #tpu.memory_space<vmem>>, vector<1x128xf32>,
      %c0_34 = arith.constant 0 : index
      %c0_35 = arith.constant 0 : index
      %43 = vector.load %arg5[%c0_34, %c0_35] : memref<8x128xf32, #tpu.memory_space<vmem>>, vector<8x128xf32>
      %cst_36 = arith.constant dense<0.000000e+00> : vector<128xf32>
      %44 = vector.multi_reduction <add>, %43, %cst_36 [0] : vector<8x128xf32> to vector<128xf32>
      %45 = vector.shape_cast %44 : vector<128xf32> to vector<1x128xf32>
      %c1 = arith.constant 1 : index
      %c0_37 = arith.constant 0 : index
      %46 = vector.load %arg3[%c1, %c0_37] : memref<4x128xf32, #tpu.memory_space<vmem>>, vector<1x128xf32>
      tpu.vector_store %arg3[%c1, %c0_37], %45 {strides = array<i32>} : memref<4x128xf32, #tpu.memory_space<vmem>>, vector<1x128xf32>,
      %c0_38 = arith.constant 0 : index
      %c0_39 = arith.constant 0 : index
      %47 = vector.load %arg6[%c0_38, %c0_39] : memref<8x128xf32, #tpu.memory_space<vmem>>, vector<8x128xf32>
      %cst_40 = arith.constant dense<0.000000e+00> : vector<128xf32>
      %48 = vector.multi_reduction <add>, %47, %cst_40 [0] : vector<8x128xf32> to vector<128xf32>
      %49 = vector.shape_cast %48 : vector<128xf32> to vector<1x128xf32>
      %c2 = arith.constant 2 : index
      %c0_41 = arith.constant 0 : index
      %50 = vector.load %arg3[%c2, %c0_41] : memref<4x128xf32, #tpu.memory_space<vmem>>, vector<1x128xf32>
      tpu.vector_store %arg3[%c2, %c0_41], %49 {strides = array<i32>} : memref<4x128xf32, #tpu.memory_space<vmem>>, vector<1x128xf32>,
      %c0_42 = arith.constant 0 : index
      %c0_43 = arith.constant 0 : index
      %51 = vector.load %arg7[%c0_42, %c0_43] : memref<8x128xf32, #tpu.memory_space<vmem>>, vector<8x128xf32>
      %cst_44 = arith.constant dense<0xFF800000> : vector<128xf32>
      %52 = vector.multi_reduction <maximumf>, %51, %cst_44 [0] : vector<8x128xf32> to vector<128xf32>
      %53 = vector.shape_cast %52 : vector<128xf32> to vector<1x128xf32>
      %c3 = arith.constant 3 : index
      %c0_45 = arith.constant 0 : index
      %54 = vector.load %arg3[%c3, %c0_45] : memref<4x128xf32, #tpu.memory_space<vmem>>, vector<1x128xf32>
      tpu.vector_store %arg3[%c3, %c0_45], %53 {strides = array<i32>} : memref<4x128xf32, #tpu.memory_space<vmem>>, vector<1x128xf32>,
    } else {
    }
    return
  }
  func.func @transform_0(%arg0: i32) -> (i32, i32) {
    %c0_i32 = arith.constant 0 : i32
    %c0_i32_0 = arith.constant 0 : i32
    return %arg0, %c0_i32 : i32, i32
  }
  func.func @transform_1(%arg0: i32) -> (i32, i32) {
    %c0_i32 = arith.constant 0 : i32
    %c0_i32_0 = arith.constant 0 : i32
    return %arg0, %c0_i32 : i32, i32
  }
  func.func @transform_2(%arg0: i32) -> (i32, i32) {
    %c0_i32 = arith.constant 0 : i32
    %c0_i32_0 = arith.constant 0 : i32
    %c0_i32_1 = arith.constant 0 : i32
    return %c0_i32, %c0_i32_0 : i32, i32
  }
}

</mosaic_0001>

<bundles_post_ra>
// kernel: tpu_custom_call.1
= control target key start
LH: loop header
LB: loop body
LE: loop exit
PB: predicated region body
PF: predicated region fallthrough
CT: control target
= control target key end

     0   :  { %7 = vsyncpa [#allocation7], 0  ;;  %s268_s0 = inlined_call_operand.hbm [shape: f32[16,128], index: 0, kind: input, shape index: {}]   ;;  %s269_s1 = inlined_call_operand.hbm [shape: f32[16,128], index: 1, kind: input, shape index: {}]   ;;  %s270_s2 = inlined_call_operand.hbm [shape: f32[4,128], index: 2, kind: output, shape index: {}]  }
   0x1   :  { %8 = vsyncpa [#allocation10], 0 }
   0x2   :  { %9 = vsyncpa [#allocation8], 0  ;;  %s211_s9 = smov [#allocation6]   ;;  %s139_s13 = scalar_lea.hbm %s268_s0, 256 }
   0x3   :  { %s15_s10 = sshll.u32 %s211_s9, 4  ;;  %p140_p0 = scmp.ne.s32.totalorder %s268_s0, %s139_s13  ;;  %s16_s10 = int_to_ptr.vmem [resolvable:$true] %s15_s10 }
   0x4   :  { %p143_p1 = scmp.lt.u32.totalorder %s139_s13, %s268_s0 }
   0x6   :  { %p145_p2 = pnand %p143_p1, %p140_p0 }
   0x8   :  { %148 = shalt.err (!%p145_p2)
}
   0x9   :  { %s149_s18 = scalar_lea.vmem %s16_s10, 256  ;;  %p154_p4 = scmp.lt.s32.totalorder %s16_s10, %s16_s10 }
   0xa   :  { %p150_p3 = scmp.ne.s32.totalorder %s16_s10, %s149_s18  ;;  %p155_p5 = scmp.lt.s32.totalorder %s149_s18, %s149_s18 }
   0xc   :  { %p156_p6 = por %p155_p5, %p154_p4 }
   0xe   :  { %p157_p7 = pnand %p156_p6, %p150_p3 }
  0x10   :  { %160 = shalt.err (!%p157_p7)
}
  0x11   :  { %s212_s19 = smov 128   ;;  %s213_s20 = smov 8  }
  0x12   :  { %21 = dma.hbm_to_vmem [thread:$0]  %s268_s0, 256, %s16_s10, [#allocation7], %s212_s19, %s212_s19, %s213_s20  }
  0x13   :  { %s214_s23 = smov [#allocation9]   ;;  %s161_s27 = scalar_lea.hbm %s269_s1, 256 }
  0x14   :  { %s27_s24 = sshll.u32 %s214_s23, 4  ;;  %p162_p8 = scmp.ne.s32.totalorder %s269_s1, %s161_s27  ;;  %s28_s24 = int_to_ptr.vmem [resolvable:$true] %s27_s24 }
  0x15   :  { %p165_p9 = scmp.lt.u32.totalorder %s161_s27, %s269_s1 }
  0x17   :  { %p167_p10 = pnand %p165_p9, %p162_p8 }
  0x19   :  { %170 = shalt.err (!%p167_p10)
}
  0x1a   :  { %s171_s4 = scalar_lea.vmem %s28_s24, 256  ;;  %p176_p12 = scmp.lt.s32.totalorder %s28_s24, %s28_s24 }
  0x1b   :  { %p172_p11 = scmp.ne.s32.totalorder %s28_s24, %s171_s4  ;;  %p177_p13 = scmp.lt.s32.totalorder %s171_s4, %s171_s4 }
  0x1d   :  { %p178_p0 = por %p177_p13, %p176_p12 }
  0x1f   :  { %p179_p1 = pnand %p178_p0, %p172_p11 }
  0x21   :  { %182 = shalt.err (!%p179_p1)
}
  0x22   :  { %33 = dma.hbm_to_vmem [thread:$0]  %s269_s1, 256, %s28_s24, [#allocation10], %s212_s19, %s212_s19, %s213_s20  }
  0x23   :  { %205 = dma.done.wait [#allocation7], 256  }
  0x24   :  { %206 = vsyncadd [#allocation7], 4294967040 }
  0x25   :  { %207 = dma.done.wait [#allocation10], 256  }
  0x26   :  { %208 = vsyncadd [#allocation10], 4294967040  ;;  %v48_v0 = vld [vmem:[#allocation6] sm:$0xff]  ;;  %v49_v1 = vld [vmem:[#allocation6 + $0x8] sm:$0xff]  ;;  %v215_v10 = vmov 0.0   ;;  %s216_s1 = smov [#allocation11]  }
  0x27   :  { %v50_v2 = vld [vmem:[#allocation9] sm:$0xff]  ;;  %v51_v3 = vld [vmem:[#allocation9 + $0x8] sm:$0xff]  ;;  %s123_s6 = sshll.u32 %s216_s1, 4  ;;  %s124_s6 = int_to_ptr.vmem [resolvable:$true] %s123_s6 }
  0x28   :  { %v52_v4 = vsub.f32 %v48_v0, %v50_v2  ;;  %v58_v5 = vand.u32 2147483647, %v50_v2  ;;  %v53_v6 = vsub.f32 %v49_v1, %v51_v3  ;;  %v59_v7 = vand.u32 2147483647, %v51_v3  ;;  %s183_s7 = scalar_lea.vmem %s124_s6, 64  ;;  %p188_p3 = scmp.lt.s32.totalorder %s124_s6, %s124_s6 }
  0x29   :  { %p184_p2 = scmp.ne.s32.totalorder %s124_s6, %s183_s7  ;;  %p189_p4 = scmp.lt.s32.totalorder %s183_s7, %s183_s7 }
  0x2a   :  { %vm60_vm0 = vcmp.gt.f32.partialorder %v58_v5, 1.0  ;;  %v54_v8 = vmul.f32 %v52_v4, %v52_v4  ;;  %v56_v9 = vand.u32 2147483647, %v52_v4  ;;  %vm61_vm1 = vcmp.gt.f32.partialorder %v59_v7, 1.0 }
  0x2b   :  { %v63_v11 = vsel %vm60_vm0, 1.0, %v215_v10  ;;  %v55_v12 = vmul.f32 %v53_v6, %v53_v6  ;;  %v57_v13 = vand.u32 2147483647, %v53_v6  ;;  %v64_v14 = vsel %vm61_vm1, 1.0, %v215_v10  ;;  %p190_p5 = por %p189_p4, %p188_p3 }
  0x2c   :  { %v69_v15 = vsel %vm60_vm0, %v54_v8, 0.0  ;;  %v65_v16 = vadd.f32 %v64_v14, %v63_v11 }
  0x2d   :  { %v70_v17 = vsel %vm61_vm1, %v55_v12, 0.0  ;;  %v75_v18 = vadd.f32 %v55_v12, %v54_v8  ;;  %v79_v19 = vmax.f32.f32 %v56_v9, %v57_v13  ;;  %p191_p6 = pnand %p190_p5, %p184_p2 }
  0x2e   :  { %v71_v20 = vadd.f32 %v70_v17, %v69_v15  ;;  %v86_v21 = vrot.slane %v65_v16, 4 }
  0x2f   :  { %v102_v22 = vrot.slane %v75_v18, 4  ;;  %v80_v23 = vmax.f32 %v79_v19, 0.0 }
  0x30   :  { %v94_v24 = vrot.slane %v71_v20, 4  ;;  %v87_v25 = vadd.f32 %v86_v21, %v65_v16 }
  0x31   :  { %v103_v26 = vadd.f32 %v102_v22, %v75_v18  ;;  %v110_v27 = vrot.slane %v80_v23, 4 }
  0x32   :  { %v95_v28 = vadd.f32 %v94_v24, %v71_v20  ;;  %v88_v29 = vrot.slane %v87_v25, 2 }
  0x33   :  { %v104_v30 = vrot.slane %v103_v26, 2  ;;  %v111_v31 = vmax.f32 %v80_v23, %v110_v27 }
  0x34   :  { %v96_v32 = vrot.slane %v95_v28, 2  ;;  %v89_v33 = vadd.f32 %v88_v29, %v87_v25 }
  0x35   :  { %v105_v34 = vadd.f32 %v104_v30, %v103_v26  ;;  %v112_v35 = vrot.slane %v111_v31, 2 }
  0x36   :  { %v97_v36 = vadd.f32 %v96_v32, %v95_v28  ;;  %v90_v37 = vrot.slane %v89_v33, 1 }
  0x37   :  { %v106_v38 = vrot.slane %v105_v34, 1  ;;  %v113_v39 = vmax.f32 %v111_v31, %v112_v35 }
  0x38   :  { %v98_v40 = vrot.slane %v97_v36, 1  ;;  %v91_v41 = vadd.f32 %v90_v37, %v89_v33 }
  0x39   :  { %v107_v42 = vadd.f32 %v106_v38, %v105_v34  ;;  %v114_v43 = vrot.slane %v113_v39, 1 }
  0x3a   :  { %v99_v44 = vadd.f32 %v98_v40, %v97_v36  ;;  %92 = vst [vmem:[#allocation11] sm:$0x1] %v91_v41 }
  0x3b   :  { %108 = vst [vmem:[#allocation11 + $0x2] sm:$0x1] %v107_v42  ;;  %v115_v45 = vmax.f32 %v113_v39, %v114_v43 }
  0x3c   :  { %100 = vst [vmem:[#allocation11 + $0x1] sm:$0x1] %v99_v44 }
  0x3d   :  { %116 = vst [vmem:[#allocation11 + $0x3] sm:$0x1] %v115_v45 }
  0x3e   :  { %194 = shalt.err (!%p191_p6)
}
  0x3f   :  { %s195_s10 = scalar_lea.hbm %s270_s2, 64 }
  0x40   :  { %p196_p7 = scmp.ne.s32.totalorder %s270_s2, %s195_s10  ;;  %p199_p8 = scmp.lt.u32.totalorder %s195_s10, %s270_s2 }
  0x42   :  { %p201_p9 = pnand %p199_p8, %p196_p7 }
  0x44   :  { %204 = shalt.err (!%p201_p9)
}
  0x45   :  { %126 = dma.vmem_to_hbm [thread:$0]  %s124_s6, 64, %s270_s2, [#allocation8]  }
  0x46   :  { %209 = dma.done.wait [#allocation8], 64  }
  0x47   :  { %210 = vsyncadd [#allocation8], 4294967232 }
  0x48   :  { %130 = vsyncpa [#allocation7], 1 }
  0x49   :  { %131 = vsyncpa [#allocation10], 1 }
  0x4a   :  { %132 = vsyncpa [#allocation8], 1 }

</bundles_post_ra>
